<compile_context>
chip_gen: v7x
topology: tpu7x:2x2x1
jax: 0.10.0
libtpu: 0.0.40
codegen_flags: <defaults>
</compile_context>

<pallas_src>
import functools
from typing import NamedTuple

import numpy as np
import jax
import jax.numpy as jnp
from jax.experimental import pallas as pl
from jax.experimental.pallas import tpu as pltpu

LANE = 128     # vreg lane width (last dim)
SUBLANE = 8    # vreg sublane width (second-to-last dim)


def _round_up(n, m):
    return ((n + m - 1) // m) * m


def _cdiv(a, b):
    return (a + b - 1) // b


@functools.lru_cache(maxsize=1)
def _tpu_generation_info():
    """(mxu_tile_dim, vmem_ceiling_bytes) for the local TPU generation.

    Conservative fallbacks (256-wide MXU pad, 48 MiB ceiling) if the backend
    cannot be identified — those are safe on every generation."""
    mxu = 256
    vmem_ceiling = 48 << 20            # v7x: 64 MiB physical per TensorCore
    try:
        kind = jax.devices()[0].device_kind.lower()
        if "v4" in kind or "v5" in kind:
            mxu = 128                  # 128x128 MXU — keep 128-lane pads (review: v5e)
            vmem_ceiling = 100 << 20   # 128 MiB physical
        elif "v6" in kind:
            mxu = 256                  # 256x256 MXU
            vmem_ceiling = 100 << 20   # 128 MiB physical
    except Exception:
        pass
    return mxu, vmem_ceiling


def _pad_feature(dim, mxu_dim):
    """Lane-dense feature pad: 128 for dims <= 128; MXU-tile aligned above."""
    if dim <= LANE:
        return _round_up(dim, LANE)
    return _round_up(dim, max(LANE, mxu_dim))


# --------------------------------------------------------------------------
# One-time parameter preparation (review #1: hoisted out of the forward path)
# --------------------------------------------------------------------------

class PreparedMLP(NamedTuple):
    weights: tuple   # W_t padded to [in_p, out_p], compute dtype (bf16)
    biases: tuple    # b padded to [1, out_p], float32
    in_dim: int      # true input feature dim
    out_dim: int     # true output feature dim


def prepare_mlp_decoder(params, *, compute_dtype=jnp.bfloat16):
    """Pad/cast (W_t [in,out], b [1,out]) params once; cache the result and
    reuse it for every forward call."""
    mxu, _ = _tpu_generation_info()
    in_dim = params[0][0].shape[0]
    out_dim = params[-1][0].shape[1]
    ws, bs = [], []
    prev_p = _pad_feature(in_dim, mxu)
    for (w, b) in params:
        fi, fo = w.shape
        fo_p = _pad_feature(fo, mxu)
        w_p = jnp.zeros((prev_p, fo_p), compute_dtype).at[:fi, :fo].set(
            w.astype(compute_dtype))
        b_p = jnp.zeros((1, fo_p), jnp.float32).at[:, :fo].set(
            b.astype(jnp.float32))
        ws.append(w_p)
        bs.append(b_p)
        prev_p = fo_p
    return PreparedMLP(tuple(ws), tuple(bs), in_dim, out_dim)


# --------------------------------------------------------------------------
# Kernel
# --------------------------------------------------------------------------

def _mlp_segment_kernel(x_ref, *refs, n_layers, relu_last):
    """Fused chain of `n_layers` Linear layers on one batch tile.
    refs = (w0, b0, w1, b1, ..., o_ref).  ReLU after every layer except
    (optionally) the last one of the segment."""
    *param_refs, o_ref = refs
    compute_dtype = param_refs[0].dtype
    h = x_ref[...].astype(compute_dtype)          # VPU cast; free if already bf16
    acc = None
    for i in range(n_layers):
        w_ref = param_refs[2 * i]
        b_ref = param_refs[2 * i + 1]
        # MXU matmul with f32 accumulation; bias add (+ ReLU) in f32 on the VPU.
        acc = jnp.dot(h, w_ref[...], preferred_element_type=jnp.float32) + b_ref[...]
        if i < n_layers - 1 or relu_last:
            acc = jnp.maximum(acc, 0.0)
        if i < n_layers - 1:
            # Downcast right after the activation (review #10): shortens the
            # f32 live range of the (tile_b x hidden) intermediate.
            h = acc.astype(compute_dtype)
    o_ref[...] = acc.astype(o_ref.dtype)


# --------------------------------------------------------------------------
# Static planning helpers (pure Python, run outside jit)
# --------------------------------------------------------------------------

def _choose_batch_tiling(B, max_tile_b, min_grid_steps):
    """Pick (tile_b, grid_steps): sublane-aligned tiles, big tiles for big B,
    little padding waste, and >= min_grid_steps steps when B allows it so the
    "parallel" batch axis can be sharded across both v7x TensorCores."""
    B8 = _round_up(max(B, 1), SUBLANE)
    steps = max(_cdiv(B8, max_tile_b), min(min_grid_steps, B8 // SUBLANE), 1)
    tile_b = _round_up(_cdiv(B8, steps), SUBLANE)
    return tile_b, steps


def _plan_segments(weights, biases, vmem_ceiling):
    """Greedy grouping of consecutive layers so each fused segment's resident
    params stay well inside the VMEM budget (review #9)."""
    budget = vmem_ceiling // 2      # leave room for I/O tiles + f32 accumulators
    segments, cur, cur_bytes = [], 0, 0
    for w, b in zip(weights, biases):
        pb = w.size * w.dtype.itemsize + b.size * b.dtype.itemsize
        if cur > 0 and cur_bytes + pb > budget:
            segments.append(cur)
            cur, cur_bytes = 0, 0
        cur += 1
        cur_bytes += pb
        # TODO(synk): a single layer larger than the budget still becomes its own
        # segment; tile its K/N dims with an extra grid axis instead.
    segments.append(cur)
    return tuple(segments)


# --------------------------------------------------------------------------
# Forward
# --------------------------------------------------------------------------

def _run_segment(x_p, ws, bs, *, tile_b, grid_steps, relu_last, out_dtype,
                 vmem_ceiling, param_buffers):
    b_p, in_p = x_p.shape
    out_p = ws[-1].shape[1]
    n_layers = len(ws)

    # Explicit VMEM limit (review #4/#5), sized from the double-buffered I/O
    # tiles + resident params + f32 intermediates, clamped to the
    # generation-aware ceiling (~100 MiB v5e/v6e, ~48 MiB v7x).
    bufs = param_buffers if param_buffers >= 1 else 2
    x_bytes = 2 * tile_b * in_p * x_p.dtype.itemsize
    o_bytes = 2 * tile_b * out_p * np.dtype(out_dtype).itemsize
    p_bytes = bufs * sum(w.size * w.dtype.itemsize + b.size * b.dtype.itemsize
                         for w, b in zip(ws, bs))
    acc_bytes = 2 * tile_b * max(w.shape[1] for w in ws) * 4
    need = x_bytes + o_bytes + p_bytes + acc_bytes
    vmem_limit = int(min(max(2 * need, 32 << 20), vmem_ceiling))

    # x / output tiled along the batch grid axis (auto double-buffered).
    in_specs = [pl.BlockSpec((tile_b, in_p), lambda i: (i, 0))]
    flat = []
    for w, b in zip(ws, bs):
        flat += [w, b]
        if param_buffers >= 1:
            # Constant index_map + single buffer: params are DMA'd once and
            # stay VMEM-resident across the whole batch grid (review #6).
            mode = pl.Buffered(param_buffers)
            in_specs.append(pl.BlockSpec(w.shape, lambda i: (0, 0),
                                         pipeline_mode=mode))
            in_specs.append(pl.BlockSpec(b.shape, lambda i: (0, 0),
                                         pipeline_mode=mode))
        else:
            in_specs.append(pl.BlockSpec(w.shape, lambda i: (0, 0)))
            in_specs.append(pl.BlockSpec(b.shape, lambda i: (0, 0)))

    kernel = functools.partial(_mlp_segment_kernel,
                               n_layers=n_layers, relu_last=relu_last)

    return pl.pallas_call(
        kernel,
        out_shape=jax.ShapeDtypeStruct((b_p, out_p), out_dtype),
        grid=(grid_steps,),
        in_specs=in_specs,
        out_specs=pl.BlockSpec((tile_b, out_p), lambda i: (i, 0)),
        compiler_params=pltpu.CompilerParams(
            dimension_semantics=("parallel",),
            vmem_limit_bytes=vmem_limit),
    )(x_p, *flat)


@functools.partial(
    jax.jit,
    static_argnames=("out_dim", "tile_b", "grid_steps", "segments",
                     "kernel_out_dtype", "param_buffers", "vmem_ceiling"))
def _forward_impl(x, weights, biases, *, out_dim, tile_b, grid_steps, segments,
                  kernel_out_dtype, param_buffers, vmem_ceiling):
    B, in_dim = x.shape
    in_p = weights[0].shape[0]
    compute_dtype = weights[0].dtype
    b_p = tile_b * grid_steps

    # Review #2: only materialize a padded copy of x when genuinely required;
    # in the aligned case the kernel reads x directly and casts on the VPU.
    if b_p == B and in_p == in_dim:
        h = x
    else:
        h = jnp.zeros((b_p, in_p), compute_dtype).at[:B, :in_dim].set(
            x.astype(compute_dtype))

    layer_idx = 0
    n_segments = len(segments)
    for si, n_layers in enumerate(segments):
        ws = weights[layer_idx:layer_idx + n_layers]
        bs = biases[layer_idx:layer_idx + n_layers]
        layer_idx += n_layers
        last_segment = (si == n_segments - 1)
        h = _run_segment(
            h, ws, bs,
            tile_b=tile_b, grid_steps=grid_steps,
            relu_last=not last_segment,
            out_dtype=kernel_out_dtype if last_segment else compute_dtype,
            vmem_ceiling=vmem_ceiling,
            param_buffers=param_buffers)

    # Padded rows/columns are sliced away (padded batch rows carry bias
    # garbage by construction — never reuse the padded buffer unsliced).
    return h[:B, :out_dim].astype(jnp.float32)


def mlp_decoder_forward(x, prepared: PreparedMLP, *, max_tile_b=512,
                        min_grid_steps=2, kernel_out_dtype=jnp.float32):
    """x: [B, input_dim] f32.  prepared: output of prepare_mlp_decoder."""
    B = x.shape[0]
    mxu, vmem_ceiling = _tpu_generation_info()
    tile_b, grid_steps = _choose_batch_tiling(B, max_tile_b, min_grid_steps)
    segments = _plan_segments(prepared.weights, prepared.biases, vmem_ceiling)

    common = dict(out_dim=prepared.out_dim, tile_b=tile_b,
                  grid_steps=grid_steps, segments=segments,
                  kernel_out_dtype=kernel_out_dtype,
                  vmem_ceiling=vmem_ceiling)
    try:
        # Single-buffered resident params (review #6, biggest win on v7x).
        return _forward_impl(x, prepared.weights, prepared.biases,
                             param_buffers=1, **common)
    except Exception:
        # pl.Buffered(1) unsupported on this jax version -> fall back to the
        # default double-buffered params (still correct, just more VMEM).
        return _forward_impl(x, prepared.weights, prepared.biases,
                             param_buffers=0, **common)


# --------------------------------------------------------------------------
# Init + references
# --------------------------------------------------------------------------

def init_mlp_decoder_params(key, input_dim, hidden_dim, output_dim, num_layers=3):
    """Deterministic synthetic init matching nn.Linear shapes.
    Returns list of (W_t [in, out], b [1, out]) for num_layers+1 linears."""
    dims = []
    for i in range(num_layers):
        dims.append((input_dim if i == 0 else hidden_dim, hidden_dim))
    dims.append((hidden_dim, output_dim))

    params = []
    for (fan_in, fan_out) in dims:
        key, kw, kb = jax.random.split(key, 3)
        bound = 1.0 / (fan_in ** 0.5)  # PyTorch default uniform bound
        w_t = jax.random.uniform(kw, (fan_in, fan_out), jnp.float32, -bound, bound)
        b = jax.random.uniform(kb, (1, fan_out), jnp.float32, -bound, bound)
        params.append((w_t, b))
    return params


def mlp_decoder_reference_f32(x, params):
    """Pure-JAX f32 reference (matches the PyTorch module exactly)."""
    h = x
    for i, (w, b) in enumerate(params):
        h = h @ w + b
        if i < len(params) - 1:
            h = jnp.maximum(h, 0.0)
    return h


def mlp_decoder_reference_bf16(x, params):
    """Reference using the same bf16-compute / f32-accumulate recipe as the kernel."""
    h = x
    for i, (w, b) in enumerate(params):
        h = jnp.dot(h.astype(jnp.bfloat16), w.astype(jnp.bfloat16),
                    preferred_element_type=jnp.float32) + b.astype(jnp.float32)
        if i < len(params) - 1:
            h = jnp.maximum(h, 0.0)
    return h


if __name__ == "__main__":
    key = jax.random.PRNGKey(0)
    k_x, k_p = jax.random.split(key)

    batch = 8
    input_dim = 32
    hidden_dim = 64
    output_dim = 16
    num_layers = 3

    x = jax.random.normal(k_x, (batch, input_dim), jnp.float32)
    params = init_mlp_decoder_params(k_p, input_dim, hidden_dim, output_dim,
                                     num_layers)

    # One-time parameter preparation (padding/casting hoisted out of forward).
    prepared = prepare_mlp_decoder(params)

    out = mlp_decoder_forward(x, prepared)
    out = jax.block_until_ready(out)
    assert out.shape == (batch, output_dim)

    # Tight check against a reference with the identical bf16/f32 numerics.
    ref_bf16 = mlp_decoder_reference_bf16(x, params)
    assert jnp.allclose(out, ref_bf16, atol=1e-3, rtol=1e-3), \
        "mismatch vs bf16-compute reference"

    # Loose check against the exact f32 PyTorch-equivalent forward.
    ref_f32 = mlp_decoder_reference_f32(x, params)
    assert jnp.allclose(out, ref_f32, atol=5e-2, rtol=5e-2), \
        "mismatch vs f32 reference"

    # Second call with an unaligned batch to exercise the adaptive multi-step
    # grid + batch-padding path.
    x2 = jax.random.normal(k_x, (300, input_dim), jnp.float32)
    out2 = jax.block_until_ready(mlp_decoder_forward(x2, prepared))
    ref2 = mlp_decoder_reference_bf16(x2, params)
    assert out2.shape == (300, output_dim)
    assert jnp.allclose(out2, ref2, atol=1e-3, rtol=1e-3), \
        "mismatch vs bf16-compute reference (padded batch)"

    print("KERNEL_OK")
</pallas_src>

<mosaic_0001>
module attributes {stable_mosaic.version = 11 : i64} {
  func.func @_mlp_segment_kernel(%arg0: i32, %arg1: memref<8x128xbf16, #tpu.memory_space<vmem>>, %arg2: memref<128x128xbf16, #tpu.memory_space<vmem>>, %arg3: memref<1x128xf32, #tpu.memory_space<vmem>>, %arg4: memref<128x128xbf16, #tpu.memory_space<vmem>>, %arg5: memref<1x128xf32, #tpu.memory_space<vmem>>, %arg6: memref<128x128xbf16, #tpu.memory_space<vmem>>, %arg7: memref<1x128xf32, #tpu.memory_space<vmem>>, %arg8: memref<128x128xbf16, #tpu.memory_space<vmem>>, %arg9: memref<1x128xf32, #tpu.memory_space<vmem>>, %arg10: memref<8x128xf32, #tpu.memory_space<vmem>>) attributes {dimension_semantics = [#tpu.dimension_semantics<parallel>], iteration_bounds = array<i64: 1>, scalar_prefetch = 0 : i64, scratch_operands = 0 : i64, tpu.core_type = #tpu.core_type<tc>, window_params = [{transform_indices = @transform_0, window_bounds = array<i64: 8, 128>}, {pipeline_mode = #tpu.pipeline_mode<synchronous>, transform_indices = @transform_1, window_bounds = array<i64: 128, 128>}, {pipeline_mode = #tpu.pipeline_mode<synchronous>, transform_indices = @transform_2, window_bounds = array<i64: 1, 128>}, {pipeline_mode = #tpu.pipeline_mode<synchronous>, transform_indices = @transform_3, window_bounds = array<i64: 128, 128>}, {pipeline_mode = #tpu.pipeline_mode<synchronous>, transform_indices = @transform_4, window_bounds = array<i64: 1, 128>}, {pipeline_mode = #tpu.pipeline_mode<synchronous>, transform_indices = @transform_5, window_bounds = array<i64: 128, 128>}, {pipeline_mode = #tpu.pipeline_mode<synchronous>, transform_indices = @transform_6, window_bounds = array<i64: 1, 128>}, {pipeline_mode = #tpu.pipeline_mode<synchronous>, transform_indices = @transform_7, window_bounds = array<i64: 128, 128>}, {pipeline_mode = #tpu.pipeline_mode<synchronous>, transform_indices = @transform_8, window_bounds = array<i64: 1, 128>}, {transform_indices = @transform_9, window_bounds = array<i64: 8, 128>}]} {
    %c0 = arith.constant 0 : index
    %c0_0 = arith.constant 0 : index
    %0 = vector.load %arg1[%c0, %c0_0] : memref<8x128xbf16, #tpu.memory_space<vmem>>, vector<8x128xbf16>
    %c0_1 = arith.constant 0 : index
    %c0_2 = arith.constant 0 : index
    %1 = vector.load %arg2[%c0_1, %c0_2] : memref<128x128xbf16, #tpu.memory_space<vmem>>, vector<128x128xbf16>
    %cst = arith.constant dense<0.000000e+00> : vector<8x128xf32>
    %2 = tpu.matmul %0, %1, %cst {dimension_numbers = #tpu.dot_dimension_numbers<[1], [0], [0], [1], [0, 0, 1, 1], [], []>} : vector<8x128xbf16>, vector<128x128xbf16>, vector<8x128xf32> -> vector<8x128xf32>
    %c0_3 = arith.constant 0 : index
    %c0_4 = arith.constant 0 : index
    %3 = vector.load %arg3[%c0_3, %c0_4] : memref<1x128xf32, #tpu.memory_space<vmem>>, vector<1x128xf32>
    %4 = vector.broadcast %3 : vector<1x128xf32> to vector<8x128xf32>
    %5 = arith.addf %2, %4 : vector<8x128xf32>
    %cst_5 = arith.constant 0.000000e+00 : f32
    %6 = vector.broadcast %cst_5 : f32 to vector<8x128xf32>
    %7 = arith.maximumf %5, %6 : vector<8x128xf32>
    %8 = arith.truncf %7 : vector<8x128xf32> to vector<8x128xbf16>
    %c0_6 = arith.constant 0 : index
    %c0_7 = arith.constant 0 : index
    %9 = vector.load %arg4[%c0_6, %c0_7] : memref<128x128xbf16, #tpu.memory_space<vmem>>, vector<128x128xbf16>
    %cst_8 = arith.constant dense<0.000000e+00> : vector<8x128xf32>
    %10 = tpu.matmul %8, %9, %cst_8 {dimension_numbers = #tpu.dot_dimension_numbers<[1], [0], [0], [1], [0, 0, 1, 1], [], []>} : vector<8x128xbf16>, vector<128x128xbf16>, vector<8x128xf32> -> vector<8x128xf32>
    %c0_9 = arith.constant 0 : index
    %c0_10 = arith.constant 0 : index
    %11 = vector.load %arg5[%c0_9, %c0_10] : memref<1x128xf32, #tpu.memory_space<vmem>>, vector<1x128xf32>
    %12 = vector.broadcast %11 : vector<1x128xf32> to vector<8x128xf32>
    %13 = arith.addf %10, %12 : vector<8x128xf32>
    %cst_11 = arith.constant 0.000000e+00 : f32
    %14 = vector.broadcast %cst_11 : f32 to vector<8x128xf32>
    %15 = arith.maximumf %13, %14 : vector<8x128xf32>
    %16 = arith.truncf %15 : vector<8x128xf32> to vector<8x128xbf16>
    %c0_12 = arith.constant 0 : index
    %c0_13 = arith.constant 0 : index
    %17 = vector.load %arg6[%c0_12, %c0_13] : memref<128x128xbf16, #tpu.memory_space<vmem>>, vector<128x128xbf16>
    %cst_14 = arith.constant dense<0.000000e+00> : vector<8x128xf32>
    %18 = tpu.matmul %16, %17, %cst_14 {dimension_numbers = #tpu.dot_dimension_numbers<[1], [0], [0], [1], [0, 0, 1, 1], [], []>} : vector<8x128xbf16>, vector<128x128xbf16>, vector<8x128xf32> -> vector<8x128xf32>
    %c0_15 = arith.constant 0 : index
    %c0_16 = arith.constant 0 : index
    %19 = vector.load %arg7[%c0_15, %c0_16] : memref<1x128xf32, #tpu.memory_space<vmem>>, vector<1x128xf32>
    %20 = vector.broadcast %19 : vector<1x128xf32> to vector<8x128xf32>
    %21 = arith.addf %18, %20 : vector<8x128xf32>
    %cst_17 = arith.constant 0.000000e+00 : f32
    %22 = vector.broadcast %cst_17 : f32 to vector<8x128xf32>
    %23 = arith.maximumf %21, %22 : vector<8x128xf32>
    %24 = arith.truncf %23 : vector<8x128xf32> to vector<8x128xbf16>
    %c0_18 = arith.constant 0 : index
    %c0_19 = arith.constant 0 : index
    %25 = vector.load %arg8[%c0_18, %c0_19] : memref<128x128xbf16, #tpu.memory_space<vmem>>, vector<128x128xbf16>
    %cst_20 = arith.constant dense<0.000000e+00> : vector<8x128xf32>
    %26 = tpu.matmul %24, %25, %cst_20 {dimension_numbers = #tpu.dot_dimension_numbers<[1], [0], [0], [1], [0, 0, 1, 1], [], []>} : vector<8x128xbf16>, vector<128x128xbf16>, vector<8x128xf32> -> vector<8x128xf32>
    %c0_21 = arith.constant 0 : index
    %c0_22 = arith.constant 0 : index
    %27 = vector.load %arg9[%c0_21, %c0_22] : memref<1x128xf32, #tpu.memory_space<vmem>>, vector<1x128xf32>
    %28 = vector.broadcast %27 : vector<1x128xf32> to vector<8x128xf32>
    %29 = arith.addf %26, %28 : vector<8x128xf32>
    %c0_23 = arith.constant 0 : index
    %c0_24 = arith.constant 0 : index
    %30 = vector.load %arg10[%c0_23, %c0_24] : memref<8x128xf32, #tpu.memory_space<vmem>>, vector<8x128xf32>
    tpu.vector_store %arg10[%c0_23, %c0_24], %29 {strides = array<i32>} : memref<8x128xf32, #tpu.memory_space<vmem>>, vector<8x128xf32>,
    return
  }
  func.func @transform_0(%arg0: i32) -> (i32, i32) {
    %c0_i32 = arith.constant 0 : i32
    %c0_i32_0 = arith.constant 0 : i32
    return %arg0, %c0_i32 : i32, i32
  }
  func.func @transform_1(%arg0: i32) -> (i32, i32) {
    %c0_i32 = arith.constant 0 : i32
    %c0_i32_0 = arith.constant 0 : i32
    %c0_i32_1 = arith.constant 0 : i32
    return %c0_i32, %c0_i32_0 : i32, i32
  }
  func.func @transform_2(%arg0: i32) -> (i32, i32) {
    %c0_i32 = arith.constant 0 : i32
    %c0_i32_0 = arith.constant 0 : i32
    %c0_i32_1 = arith.constant 0 : i32
    return %c0_i32, %c0_i32_0 : i32, i32
  }
  func.func @transform_3(%arg0: i32) -> (i32, i32) {
    %c0_i32 = arith.constant 0 : i32
    %c0_i32_0 = arith.constant 0 : i32
    %c0_i32_1 = arith.constant 0 : i32
    return %c0_i32, %c0_i32_0 : i32, i32
  }
  func.func @transform_4(%arg0: i32) -> (i32, i32) {
    %c0_i32 = arith.constant 0 : i32
    %c0_i32_0 = arith.constant 0 : i32
    %c0_i32_1 = arith.constant 0 : i32
    return %c0_i32, %c0_i32_0 : i32, i32
  }
  func.func @transform_5(%arg0: i32) -> (i32, i32) {
    %c0_i32 = arith.constant 0 : i32
    %c0_i32_0 = arith.constant 0 : i32
    %c0_i32_1 = arith.constant 0 : i32
    return %c0_i32, %c0_i32_0 : i32, i32
  }
  func.func @transform_6(%arg0: i32) -> (i32, i32) {
    %c0_i32 = arith.constant 0 : i32
    %c0_i32_0 = arith.constant 0 : i32
    %c0_i32_1 = arith.constant 0 : i32
    return %c0_i32, %c0_i32_0 : i32, i32
  }
  func.func @transform_7(%arg0: i32) -> (i32, i32) {
    %c0_i32 = arith.constant 0 : i32
    %c0_i32_0 = arith.constant 0 : i32
    %c0_i32_1 = arith.constant 0 : i32
    return %c0_i32, %c0_i32_0 : i32, i32
  }
  func.func @transform_8(%arg0: i32) -> (i32, i32) {
    %c0_i32 = arith.constant 0 : i32
    %c0_i32_0 = arith.constant 0 : i32
    %c0_i32_1 = arith.constant 0 : i32
    return %c0_i32, %c0_i32_0 : i32, i32
  }
  func.func @transform_9(%arg0: i32) -> (i32, i32) {
    %c0_i32 = arith.constant 0 : i32
    %c0_i32_0 = arith.constant 0 : i32
    return %arg0, %c0_i32 : i32, i32
  }
}

module attributes {stable_mosaic.version = 11 : i64} {
  func.func @_mlp_segment_kernel(%arg0: i32, %arg1: memref<8x128xbf16, #tpu.memory_space<vmem>>, %arg2: memref<128x128xbf16, #tpu.memory_space<vmem>>, %arg3: memref<1x128xf32, #tpu.memory_space<vmem>>, %arg4: memref<128x128xbf16, #tpu.memory_space<vmem>>, %arg5: memref<1x128xf32, #tpu.memory_space<vmem>>, %arg6: memref<128x128xbf16, #tpu.memory_space<vmem>>, %arg7: memref<1x128xf32, #tpu.memory_space<vmem>>, %arg8: memref<128x128xbf16, #tpu.memory_space<vmem>>, %arg9: memref<1x128xf32, #tpu.memory_space<vmem>>, %arg10: memref<8x128xf32, #tpu.memory_space<vmem>>) attributes {dimension_semantics = [#tpu.dimension_semantics<parallel>], iteration_bounds = array<i64: 1>, scalar_prefetch = 0 : i64, scratch_operands = 0 : i64, tpu.core_type = #tpu.core_type<tc>, window_params = [{transform_indices = @transform_0, window_bounds = array<i64: 8, 128>}, {pipeline_mode = #tpu.pipeline_mode<synchronous>, transform_indices = @transform_1, window_bounds = array<i64: 128, 128>}, {pipeline_mode = #tpu.pipeline_mode<synchronous>, transform_indices = @transform_2, window_bounds = array<i64: 1, 128>}, {pipeline_mode = #tpu.pipeline_mode<synchronous>, transform_indices = @transform_3, window_bounds = array<i64: 128, 128>}, {pipeline_mode = #tpu.pipeline_mode<synchronous>, transform_indices = @transform_4, window_bounds = array<i64: 1, 128>}, {pipeline_mode = #tpu.pipeline_mode<synchronous>, transform_indices = @transform_5, window_bounds = array<i64: 128, 128>}, {pipeline_mode = #tpu.pipeline_mode<synchronous>, transform_indices = @transform_6, window_bounds = array<i64: 1, 128>}, {pipeline_mode = #tpu.pipeline_mode<synchronous>, transform_indices = @transform_7, window_bounds = array<i64: 128, 128>}, {pipeline_mode = #tpu.pipeline_mode<synchronous>, transform_indices = @transform_8, window_bounds = array<i64: 1, 128>}, {transform_indices = @transform_9, window_bounds = array<i64: 8, 128>}]} {
    %c0 = arith.constant 0 : index
    %c0_0 = arith.constant 0 : index
    %0 = vector.load %arg1[%c0, %c0_0] : memref<8x128xbf16, #tpu.memory_space<vmem>>, vector<8x128xbf16>
    %c0_1 = arith.constant 0 : index
    %c0_2 = arith.constant 0 : index
    %1 = vector.load %arg2[%c0_1, %c0_2] : memref<128x128xbf16, #tpu.memory_space<vmem>>, vector<128x128xbf16>
    %cst = arith.constant dense<0.000000e+00> : vector<8x128xf32>
    %2 = tpu.matmul %0, %1, %cst {dimension_numbers = #tpu.dot_dimension_numbers<[1], [0], [0], [1], [0, 0, 1, 1], [], []>} : vector<8x128xbf16>, vector<128x128xbf16>, vector<8x128xf32> -> vector<8x128xf32>
    %c0_3 = arith.constant 0 : index
    %c0_4 = arith.constant 0 : index
    %3 = vector.load %arg3[%c0_3, %c0_4] : memref<1x128xf32, #tpu.memory_space<vmem>>, vector<1x128xf32>
    %4 = vector.broadcast %3 : vector<1x128xf32> to vector<8x128xf32>
    %5 = arith.addf %2, %4 : vector<8x128xf32>
    %cst_5 = arith.constant 0.000000e+00 : f32
    %6 = vector.broadcast %cst_5 : f32 to vector<8x128xf32>
    %7 = arith.maximumf %5, %6 : vector<8x128xf32>
    %8 = arith.truncf %7 : vector<8x128xf32> to vector<8x128xbf16>
    %c0_6 = arith.constant 0 : index
    %c0_7 = arith.constant 0 : index
    %9 = vector.load %arg4[%c0_6, %c0_7] : memref<128x128xbf16, #tpu.memory_space<vmem>>, vector<128x128xbf16>
    %cst_8 = arith.constant dense<0.000000e+00> : vector<8x128xf32>
    %10 = tpu.matmul %8, %9, %cst_8 {dimension_numbers = #tpu.dot_dimension_numbers<[1], [0], [0], [1], [0, 0, 1, 1], [], []>} : vector<8x128xbf16>, vector<128x128xbf16>, vector<8x128xf32> -> vector<8x128xf32>
    %c0_9 = arith.constant 0 : index
    %c0_10 = arith.constant 0 : index
    %11 = vector.load %arg5[%c0_9, %c0_10] : memref<1x128xf32, #tpu.memory_space<vmem>>, vector<1x128xf32>
    %12 = vector.broadcast %11 : vector<1x128xf32> to vector<8x128xf32>
    %13 = arith.addf %10, %12 : vector<8x128xf32>
    %cst_11 = arith.constant 0.000000e+00 : f32
    %14 = vector.broadcast %cst_11 : f32 to vector<8x128xf32>
    %15 = arith.maximumf %13, %14 : vector<8x128xf32>
    %16 = arith.truncf %15 : vector<8x128xf32> to vector<8x128xbf16>
    %c0_12 = arith.constant 0 : index
    %c0_13 = arith.constant 0 : index
    %17 = vector.load %arg6[%c0_12, %c0_13] : memref<128x128xbf16, #tpu.memory_space<vmem>>, vector<128x128xbf16>
    %cst_14 = arith.constant dense<0.000000e+00> : vector<8x128xf32>
    %18 = tpu.matmul %16, %17, %cst_14 {dimension_numbers = #tpu.dot_dimension_numbers<[1], [0], [0], [1], [0, 0, 1, 1], [], []>} : vector<8x128xbf16>, vector<128x128xbf16>, vector<8x128xf32> -> vector<8x128xf32>
    %c0_15 = arith.constant 0 : index
    %c0_16 = arith.constant 0 : index
    %19 = vector.load %arg7[%c0_15, %c0_16] : memref<1x128xf32, #tpu.memory_space<vmem>>, vector<1x128xf32>
    %20 = vector.broadcast %19 : vector<1x128xf32> to vector<8x128xf32>
    %21 = arith.addf %18, %20 : vector<8x128xf32>
    %cst_17 = arith.constant 0.000000e+00 : f32
    %22 = vector.broadcast %cst_17 : f32 to vector<8x128xf32>
    %23 = arith.maximumf %21, %22 : vector<8x128xf32>
    %24 = arith.truncf %23 : vector<8x128xf32> to vector<8x128xbf16>
    %c0_18 = arith.constant 0 : index
    %c0_19 = arith.constant 0 : index
    %25 = vector.load %arg8[%c0_18, %c0_19] : memref<128x128xbf16, #tpu.memory_space<vmem>>, vector<128x128xbf16>
    %cst_20 = arith.constant dense<0.000000e+00> : vector<8x128xf32>
    %26 = tpu.matmul %24, %25, %cst_20 {dimension_numbers = #tpu.dot_dimension_numbers<[1], [0], [0], [1], [0, 0, 1, 1], [], []>} : vector<8x128xbf16>, vector<128x128xbf16>, vector<8x128xf32> -> vector<8x128xf32>
    %c0_21 = arith.constant 0 : index
    %c0_22 = arith.constant 0 : index
    %27 = vector.load %arg9[%c0_21, %c0_22] : memref<1x128xf32, #tpu.memory_space<vmem>>, vector<1x128xf32>
    %28 = vector.broadcast %27 : vector<1x128xf32> to vector<8x128xf32>
    %29 = arith.addf %26, %28 : vector<8x128xf32>
    %c0_23 = arith.constant 0 : index
    %c0_24 = arith.constant 0 : index
    %30 = vector.load %arg10[%c0_23, %c0_24] : memref<8x128xf32, #tpu.memory_space<vmem>>, vector<8x128xf32>
    tpu.vector_store %arg10[%c0_23, %c0_24], %29 {strides = array<i32>} : memref<8x128xf32, #tpu.memory_space<vmem>>, vector<8x128xf32>,
    return
  }
  func.func @transform_0(%arg0: i32) -> (i32, i32) {
    %c0_i32 = arith.constant 0 : i32
    %c0_i32_0 = arith.constant 0 : i32
    return %arg0, %c0_i32 : i32, i32
  }
  func.func @transform_1(%arg0: i32) -> (i32, i32) {
    %c0_i32 = arith.constant 0 : i32
    %c0_i32_0 = arith.constant 0 : i32
    %c0_i32_1 = arith.constant 0 : i32
    return %c0_i32, %c0_i32_0 : i32, i32
  }
  func.func @transform_2(%arg0: i32) -> (i32, i32) {
    %c0_i32 = arith.constant 0 : i32
    %c0_i32_0 = arith.constant 0 : i32
    %c0_i32_1 = arith.constant 0 : i32
    return %c0_i32, %c0_i32_0 : i32, i32
  }
  func.func @transform_3(%arg0: i32) -> (i32, i32) {
    %c0_i32 = arith.constant 0 : i32
    %c0_i32_0 = arith.constant 0 : i32
    %c0_i32_1 = arith.constant 0 : i32
    return %c0_i32, %c0_i32_0 : i32, i32
  }
  func.func @transform_4(%arg0: i32) -> (i32, i32) {
    %c0_i32 = arith.constant 0 : i32
    %c0_i32_0 = arith.constant 0 : i32
    %c0_i32_1 = arith.constant 0 : i32
    return %c0_i32, %c0_i32_0 : i32, i32
  }
  func.func @transform_5(%arg0: i32) -> (i32, i32) {
    %c0_i32 = arith.constant 0 : i32
    %c0_i32_0 = arith.constant 0 : i32
    %c0_i32_1 = arith.constant 0 : i32
    return %c0_i32, %c0_i32_0 : i32, i32
  }
  func.func @transform_6(%arg0: i32) -> (i32, i32) {
    %c0_i32 = arith.constant 0 : i32
    %c0_i32_0 = arith.constant 0 : i32
    %c0_i32_1 = arith.constant 0 : i32
    return %c0_i32, %c0_i32_0 : i32, i32
  }
  func.func @transform_7(%arg0: i32) -> (i32, i32) {
    %c0_i32 = arith.constant 0 : i32
    %c0_i32_0 = arith.constant 0 : i32
    %c0_i32_1 = arith.constant 0 : i32
    return %c0_i32, %c0_i32_0 : i32, i32
  }
  func.func @transform_8(%arg0: i32) -> (i32, i32) {
    %c0_i32 = arith.constant 0 : i32
    %c0_i32_0 = arith.constant 0 : i32
    %c0_i32_1 = arith.constant 0 : i32
    return %c0_i32, %c0_i32_0 : i32, i32
  }
  func.func @transform_9(%arg0: i32) -> (i32, i32) {
    %c0_i32 = arith.constant 0 : i32
    %c0_i32_0 = arith.constant 0 : i32
    return %arg0, %c0_i32 : i32, i32
  }
}

</mosaic_0001>

<bundles_post_ra>
// kernel: _forward_impl.1
= control target key start
LH: loop header
LB: loop body
LE: loop exit
PB: predicated region body
PF: predicated region fallthrough
CT: control target
= control target key end

     0   :  { %14 = vsyncpa [#allocation3], 0  ;;  %s1069_s0 = inlined_call_operand.vmem [shape: bf16[8,128], index: 0, kind: input, shape index: {}]   ;;  %s1070_s1 = inlined_call_operand.hbm [shape: bf16[128,128], index: 1, kind: input, shape index: {}]   ;;  %s1071_s2 = inlined_call_operand.vmem [shape: f32[1,128], index: 2, kind: input, shape index: {}]   ;;  %s1072_s3 = inlined_call_operand.hbm [shape: bf16[128,128], index: 3, kind: input, shape index: {}]   ;;  %s1073_s4 = inlined_call_operand.vmem [shape: f32[1,128], index: 4, kind: input, shape index: {}]   ;;  %s1074_s5 = inlined_call_operand.hbm [shape: bf16[128,128], index: 5, kind: input, shape index: {}]   ;;  %s1075_s6 = inlined_call_operand.vmem [shape: f32[1,128], index: 6, kind: input, shape index: {}]   ;;  %s1076_s7 = inlined_call_operand.hbm [shape: bf16[128,128], index: 7, kind: input, shape index: {}]   ;;  %s1077_s8 = inlined_call_operand.vmem [shape: f32[1,128], index: 8, kind: input, shape index: {}]   ;;  %s1078_s9 = inlined_call_operand.hbm [shape: f32[8,128], index: 9, kind: output, shape index: {}]  }
   0x1   :  { %15 = vsyncpa [#allocation6], 0 }
   0x2   :  { %16 = vsyncpa [#allocation9], 0 }
   0x3   :  { %17 = vsyncpa [#allocation4], 0  ;;  %s869_s30 = smov [#allocation5]   ;;  %s870_s11 = smov [#allocation2]  }
   0x4   :  { %s39_s10 = sshll.u32 %s869_s30, 4  ;;  %s25_s12 = sshll.u32 %s870_s11, 4  ;;  %s40_s10 = int_to_ptr.vmem [resolvable:$true] %s39_s10  ;;  %s928_s12 = int_to_ptr.vmem [resolvable:$true] %s25_s12 }
   0x5   :  { %s751_s15 = scalar_lea.hbm %s1072_s3, 1024 }
   0x6   :  { %p752_p0 = scmp.ne.s32.totalorder %s1072_s3, %s751_s15  ;;  %p755_p1 = scmp.lt.u32.totalorder %s751_s15, %s1072_s3 }
   0x8   :  { %p757_p2 = pnand %p755_p1, %p752_p0 }
   0xa   :  { %760 = shalt.err (!%p757_p2)
}
   0xb   :  { %s761_s20 = scalar_lea.vmem %s40_s10, 1024  ;;  %p766_p4 = scmp.lt.s32.totalorder %s40_s10, %s40_s10 }
   0xc   :  { %p762_p3 = scmp.ne.s32.totalorder %s40_s10, %s761_s20  ;;  %p767_p5 = scmp.lt.s32.totalorder %s761_s20, %s761_s20 }
   0xe   :  { %p768_p6 = por %p767_p5, %p766_p4 }
  0x10   :  { %p769_p7 = pnand %p768_p6, %p762_p3 }
  0x12   :  { %772 = shalt.err (!%p769_p7)
}
  0x13   :  { %s871_s21 = smov 64   ;;  %s872_s22 = smov 4  }
  0x14   :  { %45 = dma.hbm_to_vmem [thread:$0]  %s1072_s3, 1024, %s40_s10, [#allocation6], %s871_s21, %s871_s21, %s872_s22  }
  0x15   :  { %s773_s27 = scalar_lea.hbm %s1070_s1, 1024 }
  0x16   :  { %p774_p8 = scmp.ne.s32.totalorder %s1070_s1, %s773_s27  ;;  %p777_p9 = scmp.lt.u32.totalorder %s773_s27, %s1070_s1 }
  0x18   :  { %p779_p10 = pnand %p777_p9, %p774_p8 }
  0x1a   :  { %782 = shalt.err (!%p779_p10)
}
  0x1b   :  { %s783_s13 = scalar_lea.vmem %s928_s12, 1024  ;;  %p788_p12 = scmp.lt.s32.totalorder %s928_s12, %s928_s12 }
  0x1c   :  { %p784_p11 = scmp.ne.s32.totalorder %s928_s12, %s783_s13  ;;  %p789_p13 = scmp.lt.s32.totalorder %s783_s13, %s783_s13 }
  0x1e   :  { %p790_p0 = por %p789_p13, %p788_p12 }
  0x20   :  { %p791_p1 = pnand %p790_p0, %p784_p11 }
  0x22   :  { %794 = shalt.err (!%p791_p1)
}
  0x23   :  { %31 = dma.hbm_to_vmem [thread:$0]  %s1070_s1, 1024, %s928_s12, [#allocation3], %s871_s21, %s871_s21, %s872_s22  }
  0x24   :  { %s873_s14 = smov [#allocation7]   ;;  %s874_s16 = smov [#allocation8]  }
  0x25   :  { %s53_s15 = sshll.u32 %s873_s14, 4  ;;  %s67_s17 = sshll.u32 %s874_s16, 4  ;;  %s54_s15 = int_to_ptr.vmem [resolvable:$true] %s53_s15  ;;  %s965_s17 = int_to_ptr.vmem [resolvable:$true] %s67_s17 }
  0x26   :  { %s795_s20 = scalar_lea.hbm %s1074_s5, 1024 }
  0x27   :  { %p796_p2 = scmp.ne.s32.totalorder %s1074_s5, %s795_s20  ;;  %p799_p3 = scmp.lt.u32.totalorder %s795_s20, %s1074_s5 }
  0x29   :  { %p801_p4 = pnand %p799_p3, %p796_p2 }
  0x2b   :  { %804 = shalt.err (!%p801_p4)
}
  0x2c   :  { %s805_s1 = scalar_lea.vmem %s54_s15, 1024  ;;  %p810_p6 = scmp.lt.s32.totalorder %s54_s15, %s54_s15 }
  0x2d   :  { %p806_p5 = scmp.ne.s32.totalorder %s54_s15, %s805_s1  ;;  %p811_p7 = scmp.lt.s32.totalorder %s805_s1, %s805_s1 }
  0x2f   :  { %p812_p8 = por %p811_p7, %p810_p6 }
  0x31   :  { %p813_p9 = pnand %p812_p8, %p806_p5 }
  0x33   :  { %816 = shalt.err (!%p813_p9)
}
  0x34   :  { %59 = dma.hbm_to_vmem [thread:$0]  %s1074_s5, 1024, %s54_s15, [#allocation6], %s871_s21, %s871_s21, %s872_s22  }
  0x35   :  { %s817_s30 = scalar_lea.hbm %s1076_s7, 1024 }
  0x36   :  { %p818_p10 = scmp.ne.s32.totalorder %s1076_s7, %s817_s30  ;;  %p821_p11 = scmp.lt.u32.totalorder %s817_s30, %s1076_s7 }
  0x38   :  { %p823_p12 = pnand %p821_p11, %p818_p10 }
  0x3a   :  { %826 = shalt.err (!%p823_p12)
}
  0x3b   :  { %s827_s14 = scalar_lea.vmem %s965_s17, 1024  ;;  %p832_p0 = scmp.lt.s32.totalorder %s965_s17, %s965_s17 }
  0x3c   :  { %p828_p13 = scmp.ne.s32.totalorder %s965_s17, %s827_s14  ;;  %p833_p1 = scmp.lt.s32.totalorder %s827_s14, %s827_s14 }
  0x3e   :  { %p834_p2 = por %p833_p1, %p832_p0 }
  0x40   :  { %p835_p3 = pnand %p834_p2, %p828_p13 }
  0x42   :  { %838 = shalt.err (!%p835_p3)
}
  0x43   :  { %73 = dma.hbm_to_vmem [thread:$0]  %s1076_s7, 1024, %s965_s17, [#allocation9], %s871_s21, %s871_s21, %s872_s22  }
  0x44   :  { %861 = dma.done.wait [#allocation3], 1024  }
  0x45   :  { %862 = vsyncadd [#allocation3], 4294966272 }
  0x46   :  { %863 = dma.done.wait [#allocation6], 2048  }
  0x47   :  { %864 = vsyncadd [#allocation6], 4294965248 }
  0x48   :  { %865 = dma.done.wait [#allocation9], 1024  }
  0x49   :  { %866 = vsyncadd [#allocation9], 4294966272  ;;  %v875_v0 = vmov 0.0   ;;  %vm876_vm0 = vmmov 0   ;;  %v719_v1 = vld [vmem:[#allocation2] sm:$0xff]   ;;  %v720_v2 = vld [vmem:[#allocation2 + $0x8] sm:$0xff]  }
  0x4a   :  { %630 = vmatprep.subr.bf16.mxu0 %v875_v0  ;;  %646 = vmatprep.mubr.msk.bf16.mxu0 %vm876_vm0, %v875_v0  ;;  %v721_v3 = vld [vmem:[#allocation2 + $0x10] sm:$0xff]   ;;  %v727_v4 = vld [vmem:[#allocation5] sm:$0xff]   ;;  %v722_v5 = vld [vmem:[#allocation2 + $0x18] sm:$0xff]   ;;  %s877_s20 = smov [#allocation10]  }
  0x4b   :  { %650 = vmatprep.subr.bf16.mxu1 %v875_v0  ;;  %666 = vmatprep.mubr.msk.bf16.mxu1 %vm876_vm0, %v875_v0  ;;  %v728_v6 = vld [vmem:[#allocation5 + $0x8] sm:$0xff]   ;;  %v723_v7 = vld [vmem:[#allocation2 + $0x20] sm:$0xff]   ;;  %v729_v8 = vld [vmem:[#allocation5 + $0x10] sm:$0xff]   ;;  %s547_s23 = sshll.u32 %s877_s20, 4  ;;  %s548_s23 = int_to_ptr.vmem [resolvable:$true] %s547_s23 }
  0x4c   :  { %631 = vmatpush3.bf16.msra.mxu0 %v719_v1  ;;  %651 = vmatpush3.bf16.msra.mxu1 %v727_v4  ;;  %v724_v9 = vld [vmem:[#allocation2 + $0x28] sm:$0xff]   ;;  %v730_v10 = vld [vmem:[#allocation5 + $0x18] sm:$0xff]   ;;  %v725_v11 = vld [vmem:[#allocation2 + $0x30] sm:$0xff]   ;;  %p844_p5 = scmp.lt.s32.totalorder %s548_s23, %s548_s23 }
  0x4d   :  { %632 = vmatprep.subr.bf16.mxu0 %v875_v0  ;;  %652 = vmatprep.subr.bf16.mxu1 %v875_v0  ;;  %v731_v12 = vld [vmem:[#allocation5 + $0x20] sm:$0xff]   ;;  %v726_v13 = vld [vmem:[#allocation2 + $0x38] sm:$0xff]   ;;  %v732_v14 = vld [vmem:[#allocation5 + $0x28] sm:$0xff]  }
  0x4e   :  { %v89_v15 = vld [vmem:[%s1069_s0] sm:$0xf]  ;;  %v733_v16 = vld [vmem:[#allocation5 + $0x30] sm:$0xff]   ;;  %v734_v17 = vld [vmem:[#allocation5 + $0x38] sm:$0xff]  }
  0x4f   :  { %v735_v18 = vld [vmem:[#allocation7] sm:$0xff]   ;;  %v736_v19 = vld [vmem:[#allocation7 + $0x8] sm:$0xff]   ;;  %v737_v20 = vld [vmem:[#allocation7 + $0x10] sm:$0xff]  }
  0x50   :  { %633 = vmatpush3.bf16.msra.mxu0 %v720_v2  ;;  %653 = vmatpush3.bf16.msra.mxu1 %v728_v6  ;;  %v738_v21 = vld [vmem:[#allocation7 + $0x18] sm:$0xff]   ;;  %v739_v22 = vld [vmem:[#allocation7 + $0x20] sm:$0xff]   ;;  %v740_v23 = vld [vmem:[#allocation7 + $0x28] sm:$0xff]  }
  0x51   :  { %634 = vmatprep.subr.bf16.mxu0 %v875_v0  ;;  %654 = vmatprep.subr.bf16.mxu1 %v875_v0  ;;  %v558_v24 = vld [vmem:[%s1071_s2] ss:$0 sm:$0xff]  ;;  %v741_v32 = vld [vmem:[#allocation7 + $0x30] sm:$0xff]   ;;  %v742_v33 = vld [vmem:[#allocation7 + $0x38] sm:$0xff]  }
  0x52   :  { %v743_v34 = vld [vmem:[#allocation8] sm:$0xff]   ;;  %v744_v35 = vld [vmem:[#allocation8 + $0x8] sm:$0xff]   ;;  %v745_v36 = vld [vmem:[#allocation8 + $0x10] sm:$0xff]  }
  0x53   :  { %v746_v37 = vld [vmem:[#allocation8 + $0x18] sm:$0xff]   ;;  %v747_v38 = vld [vmem:[#allocation8 + $0x20] sm:$0xff]   ;;  %v748_v39 = vld [vmem:[#allocation8 + $0x28] sm:$0xff]  }
  0x54   :  { %635 = vmatpush3.bf16.msra.mxu0 %v721_v3  ;;  %655 = vmatpush3.bf16.msra.mxu1 %v729_v8  ;;  %v567_v40 = vld [vmem:[%s1073_s4] ss:$0 sm:$0xff]  ;;  %v749_v48 = vld [vmem:[#allocation8 + $0x30] sm:$0xff]   ;;  %v750_v49 = vld [vmem:[#allocation8 + $0x38] sm:$0xff]  }
  0x55   :  { %636 = vmatprep.subr.bf16.mxu0 %v875_v0  ;;  %656 = vmatprep.subr.bf16.mxu1 %v875_v0  ;;  %v576_v50 = vld [vmem:[%s1075_s6] ss:$0 sm:$0xff]  ;;  %s839_s6 = scalar_lea.vmem %s548_s23, 128 }
  0x56   :  { %v585_v58 = vld [vmem:[%s1077_s8] ss:$0 sm:$0xff]  ;;  %p840_p4 = scmp.ne.s32.totalorder %s548_s23, %s839_s6  ;;  %p845_p6 = scmp.lt.s32.totalorder %s839_s6, %s839_s6 }
  0x58   :  { %637 = vmatpush3.bf16.msra.mxu0 %v722_v5  ;;  %657 = vmatpush3.bf16.msra.mxu1 %v730_v10  ;;  %p846_p7 = por %p845_p6, %p844_p5 }
  0x59   :  { %638 = vmatprep.subr.bf16.mxu0 %v875_v0  ;;  %658 = vmatprep.subr.bf16.mxu1 %v875_v0 }
  0x5a   :  { %p847_p8 = pnand %p846_p7, %p840_p4 }
  0x5c   :  { %639 = vmatpush3.bf16.msra.mxu0 %v723_v7  ;;  %659 = vmatpush3.bf16.msra.mxu1 %v731_v12 }
  0x5d   :  { %640 = vmatprep.subr.bf16.mxu0 %v875_v0  ;;  %660 = vmatprep.subr.bf16.mxu1 %v875_v0 }
  0x60   :  { %641 = vmatpush3.bf16.msra.mxu0 %v724_v9  ;;  %661 = vmatpush3.bf16.msra.mxu1 %v732_v14 }
  0x61   :  { %642 = vmatprep.subr.bf16.mxu0 %v875_v0  ;;  %662 = vmatprep.subr.bf16.mxu1 %v875_v0 }
  0x64   :  { %643 = vmatpush3.bf16.msra.mxu0 %v725_v11  ;;  %663 = vmatpush3.bf16.msra.mxu1 %v733_v16 }
  0x65   :  { %644 = vmatprep.subr.bf16.mxu0 %v875_v0  ;;  %664 = vmatprep.subr.bf16.mxu1 %v875_v0 }
  0x68   :  { %645 = vmatpush3.bf16.msra.mxu0 %v726_v13  ;;  %665 = vmatpush3.bf16.msra.mxu1 %v734_v17 }
  0x69   :  { %670 = vmatprep.subr.bf16.mxu0 %v875_v0  ;;  %690 = vmatprep.subr.bf16.mxu1 %v875_v0 }
  0x6b   :  { %647 = vmatmul.mubr.bf16.vlgmr.msra.gmra.mrb[0].mxu0 %v89_v15 }
  0x6c   :  { %686 = vmatprep.mubr.msk.bf16.mxu0 %vm876_vm0, %v875_v0  ;;  %671 = vmatpush3.bf16.msra.mxu0 %v735_v18 }
  0x6d   :  { %672 = vmatprep.subr.bf16.mxu0 %v875_v0 }
  0x70   :  { %673 = vmatpush3.bf16.msra.mxu0 %v736_v19 }
  0x71   :  { %674 = vmatprep.subr.bf16.mxu0 %v875_v0 }
  0x74   :  { %675 = vmatpush3.bf16.msra.mxu0 %v737_v20 }
  0x75   :  { %676 = vmatprep.subr.bf16.mxu0 %v875_v0 }
  0x78   :  { %677 = vmatpush3.bf16.msra.mxu0 %v738_v21 }
  0x79   :  { %678 = vmatprep.subr.bf16.mxu0 %v875_v0 }
  0x7c   :  { %679 = vmatpush3.bf16.msra.mxu0 %v739_v22 }
  0x7d   :  { %680 = vmatprep.subr.bf16.mxu0 %v875_v0 }
  0x80   :  { %681 = vmatpush3.bf16.msra.mxu0 %v740_v23 }
  0x81   :  { %682 = vmatprep.subr.bf16.mxu0 %v875_v0 }
  0x84   :  { %683 = vmatpush3.bf16.msra.mxu0 %v741_v32 }
  0x85   :  { %684 = vmatprep.subr.bf16.mxu0 %v875_v0 }
  0x88   :  { %685 = vmatpush3.bf16.msra.mxu0 %v742_v33 }
 0x13e   :  { %v195_v25 = vpop.f32.mrb[0].mxu0 }
 0x13f   :  { %v196_v26 = vadd.f32 %v558_v24, %v195_v25  ;;  %v648_v27 = vpop.f32.mrb[1].mxu0 }
 0x140   :  { %v198_v28 = vpop.f32.mrb[2].mxu0 }
 0x141   :  { %v201_v29 = vmax.f32 %v196_v26, 0.0  ;;  %v649_v30 = vpop.f32.mrb[3].mxu0 }
 0x143   :  { %v202_v31 = vpack.c.bf16 %v201_v29, %v201_v29 }
 0x145   :  { %667 = vmatmul.mubr.bf16.vlgmr.msra.gmra.mrb[0].mxu1 %v202_v31 }
 0x146   :  { %706 = vmatprep.mubr.msk.bf16.mxu1 %vm876_vm0, %v875_v0  ;;  %691 = vmatpush3.bf16.msra.mxu1 %v743_v34 }
 0x147   :  { %692 = vmatprep.subr.bf16.mxu1 %v875_v0 }
 0x14a   :  { %693 = vmatpush3.bf16.msra.mxu1 %v744_v35 }
 0x14b   :  { %694 = vmatprep.subr.bf16.mxu1 %v875_v0 }
 0x14e   :  { %695 = vmatpush3.bf16.msra.mxu1 %v745_v36 }
 0x14f   :  { %696 = vmatprep.subr.bf16.mxu1 %v875_v0 }
 0x152   :  { %697 = vmatpush3.bf16.msra.mxu1 %v746_v37 }
 0x153   :  { %698 = vmatprep.subr.bf16.mxu1 %v875_v0 }
 0x156   :  { %699 = vmatpush3.bf16.msra.mxu1 %v747_v38 }
 0x157   :  { %700 = vmatprep.subr.bf16.mxu1 %v875_v0 }
 0x15a   :  { %701 = vmatpush3.bf16.msra.mxu1 %v748_v39 }
 0x15b   :  { %702 = vmatprep.subr.bf16.mxu1 %v875_v0 }
 0x15e   :  { %703 = vmatpush3.bf16.msra.mxu1 %v749_v48 }
 0x15f   :  { %704 = vmatprep.subr.bf16.mxu1 %v875_v0 }
 0x162   :  { %705 = vmatpush3.bf16.msra.mxu1 %v750_v49 }
 0x218   :  { %v308_v41 = vpop.f32.mrb[0].mxu1 }
 0x219   :  { %v309_v42 = vadd.f32 %v567_v40, %v308_v41  ;;  %v668_v43 = vpop.f32.mrb[1].mxu1 }
 0x21a   :  { %v311_v44 = vpop.f32.mrb[2].mxu1 }
 0x21b   :  { %v314_v45 = vmax.f32 %v309_v42, 0.0  ;;  %v669_v46 = vpop.f32.mrb[3].mxu1 }
 0x21d   :  { %v315_v47 = vpack.c.bf16 %v314_v45, %v314_v45 }
 0x21f   :  { %687 = vmatmul.mubr.bf16.vlgmr.msra.gmra.mrb[4].mxu0 %v315_v47 }
 0x2f2   :  { %v421_v51 = vpop.f32.mrb[4].mxu0 }
 0x2f3   :  { %v422_v52 = vadd.f32 %v576_v50, %v421_v51  ;;  %v688_v53 = vpop.f32.mrb[5].mxu0 }
 0x2f4   :  { %v424_v54 = vpop.f32.mrb[6].mxu0 }
 0x2f5   :  { %v427_v55 = vmax.f32 %v422_v52, 0.0  ;;  %v689_v56 = vpop.f32.mrb[7].mxu0 }
 0x2f7   :  { %v428_v57 = vpack.c.bf16 %v427_v55, %v427_v55 }
 0x2f9   :  { %707 = vmatmul.mubr.bf16.vlgmr.msra.gmra.mrb[4].mxu1 %v428_v57 }
 0x3cc   :  { %v534_v59 = vpop.f32.mrb[4].mxu1 }
 0x3cd   :  { %v535_v60 = vadd.f32 %v585_v58, %v534_v59  ;;  %v708_v61 = vpop.f32.mrb[5].mxu1 }
 0x3ce   :  { %v537_v62 = vpop.f32.mrb[6].mxu1 }
 0x3cf   :  { %540 = vst [vmem:[#allocation10] sm:$0xff] %v535_v60  ;;  %v709_v63 = vpop.f32.mrb[7].mxu1 }
 0x3d0   :  { %850 = shalt.err (!%p847_p8)
}
 0x3d1   :  { %s851_s8 = scalar_lea.hbm %s1078_s9, 128 }
 0x3d2   :  { %p852_p9 = scmp.ne.s32.totalorder %s1078_s9, %s851_s8  ;;  %p855_p10 = scmp.lt.u32.totalorder %s851_s8, %s1078_s9 }
 0x3d4   :  { %p857_p11 = pnand %p855_p10, %p852_p9 }
 0x3d6   :  { %860 = shalt.err (!%p857_p11)
}
 0x3d7   :  { %550 = dma.vmem_to_hbm [thread:$0]  %s548_s23, 128, %s1078_s9, [#allocation4]  }
 0x3d8   :  { %867 = dma.done.wait [#allocation4], 128  }
 0x3d9   :  { %868 = vsyncadd [#allocation4], 4294967168 }
 0x3da   :  { %554 = vsyncpa [#allocation3], 1 }
 0x3db   :  { %555 = vsyncpa [#allocation6], 1 }
 0x3dc   :  { %556 = vsyncpa [#allocation9], 1 }
 0x3dd   :  { %557 = vsyncpa [#allocation4], 1 }

// kernel: _forward_impl.1
= control target key start
LH: loop header
LB: loop body
LE: loop exit
PB: predicated region body
PF: predicated region fallthrough
CT: control target
= control target key end

     0   :  { %14 = vsyncpa [#allocation3], 0  ;;  %s1069_s0 = inlined_call_operand.vmem [shape: bf16[8,128], index: 0, kind: input, shape index: {}]   ;;  %s1070_s1 = inlined_call_operand.hbm [shape: bf16[128,128], index: 1, kind: input, shape index: {}]   ;;  %s1071_s2 = inlined_call_operand.vmem [shape: f32[1,128], index: 2, kind: input, shape index: {}]   ;;  %s1072_s3 = inlined_call_operand.hbm [shape: bf16[128,128], index: 3, kind: input, shape index: {}]   ;;  %s1073_s4 = inlined_call_operand.vmem [shape: f32[1,128], index: 4, kind: input, shape index: {}]   ;;  %s1074_s5 = inlined_call_operand.hbm [shape: bf16[128,128], index: 5, kind: input, shape index: {}]   ;;  %s1075_s6 = inlined_call_operand.vmem [shape: f32[1,128], index: 6, kind: input, shape index: {}]   ;;  %s1076_s7 = inlined_call_operand.hbm [shape: bf16[128,128], index: 7, kind: input, shape index: {}]   ;;  %s1077_s8 = inlined_call_operand.vmem [shape: f32[1,128], index: 8, kind: input, shape index: {}]   ;;  %s1078_s9 = inlined_call_operand.hbm [shape: f32[8,128], index: 9, kind: output, shape index: {}]  }
   0x1   :  { %15 = vsyncpa [#allocation6], 0 }
   0x2   :  { %16 = vsyncpa [#allocation9], 0 }
   0x3   :  { %17 = vsyncpa [#allocation4], 0  ;;  %s869_s30 = smov [#allocation5]   ;;  %s870_s11 = smov [#allocation2]  }
   0x4   :  { %s39_s10 = sshll.u32 %s869_s30, 4  ;;  %s25_s12 = sshll.u32 %s870_s11, 4  ;;  %s40_s10 = int_to_ptr.vmem [resolvable:$true] %s39_s10  ;;  %s928_s12 = int_to_ptr.vmem [resolvable:$true] %s25_s12 }
   0x5   :  { %s751_s15 = scalar_lea.hbm %s1072_s3, 1024 }
   0x6   :  { %p752_p0 = scmp.ne.s32.totalorder %s1072_s3, %s751_s15  ;;  %p755_p1 = scmp.lt.u32.totalorder %s751_s15, %s1072_s3 }
   0x8   :  { %p757_p2 = pnand %p755_p1, %p752_p0 }
   0xa   :  { %760 = shalt.err (!%p757_p2)
}
   0xb   :  { %s761_s20 = scalar_lea.vmem %s40_s10, 1024  ;;  %p766_p4 = scmp.lt.s32.totalorder %s40_s10, %s40_s10 }
   0xc   :  { %p762_p3 = scmp.ne.s32.totalorder %s40_s10, %s761_s20  ;;  %p767_p5 = scmp.lt.s32.totalorder %s761_s20, %s761_s20 }
   0xe   :  { %p768_p6 = por %p767_p5, %p766_p4 }
  0x10   :  { %p769_p7 = pnand %p768_p6, %p762_p3 }
  0x12   :  { %772 = shalt.err (!%p769_p7)
}
  0x13   :  { %s871_s21 = smov 64   ;;  %s872_s22 = smov 4  }
  0x14   :  { %45 = dma.hbm_to_vmem [thread:$0]  %s1072_s3, 1024, %s40_s10, [#allocation6], %s871_s21, %s871_s21, %s872_s22  }
  0x15   :  { %s773_s27 = scalar_lea.hbm %s1070_s1, 1024 }
  0x16   :  { %p774_p8 = scmp.ne.s32.totalorder %s1070_s1, %s773_s27  ;;  %p777_p9 = scmp.lt.u32.totalorder %s773_s27, %s1070_s1 }
  0x18   :  { %p779_p10 = pnand %p777_p9, %p774_p8 }
  0x1a   :  { %782 = shalt.err (!%p779_p10)
}
  0x1b   :  { %s783_s13 = scalar_lea.vmem %s928_s12, 1024  ;;  %p788_p12 = scmp.lt.s32.totalorder %s928_s12, %s928_s12 }
  0x1c   :  { %p784_p11 = scmp.ne.s32.totalorder %s928_s12, %s783_s13  ;;  %p789_p13 = scmp.lt.s32.totalorder %s783_s13, %s783_s13 }
  0x1e   :  { %p790_p0 = por %p789_p13, %p788_p12 }
  0x20   :  { %p791_p1 = pnand %p790_p0, %p784_p11 }
  0x22   :  { %794 = shalt.err (!%p791_p1)
}
  0x23   :  { %31 = dma.hbm_to_vmem [thread:$0]  %s1070_s1, 1024, %s928_s12, [#allocation3], %s871_s21, %s871_s21, %s872_s22  }
  0x24   :  { %s873_s14 = smov [#allocation7]   ;;  %s874_s16 = smov [#allocation8]  }
  0x25   :  { %s53_s15 = sshll.u32 %s873_s14, 4  ;;  %s67_s17 = sshll.u32 %s874_s16, 4  ;;  %s54_s15 = int_to_ptr.vmem [resolvable:$true] %s53_s15  ;;  %s965_s17 = int_to_ptr.vmem [resolvable:$true] %s67_s17 }
  0x26   :  { %s795_s20 = scalar_lea.hbm %s1074_s5, 1024 }
  0x27   :  { %p796_p2 = scmp.ne.s32.totalorder %s1074_s5, %s795_s20  ;;  %p799_p3 = scmp.lt.u32.totalorder %s795_s20, %s1074_s5 }
  0x29   :  { %p801_p4 = pnand %p799_p3, %p796_p2 }
  0x2b   :  { %804 = shalt.err (!%p801_p4)
}
  0x2c   :  { %s805_s1 = scalar_lea.vmem %s54_s15, 1024  ;;  %p810_p6 = scmp.lt.s32.totalorder %s54_s15, %s54_s15 }
  0x2d   :  { %p806_p5 = scmp.ne.s32.totalorder %s54_s15, %s805_s1  ;;  %p811_p7 = scmp.lt.s32.totalorder %s805_s1, %s805_s1 }
  0x2f   :  { %p812_p8 = por %p811_p7, %p810_p6 }
  0x31   :  { %p813_p9 = pnand %p812_p8, %p806_p5 }
  0x33   :  { %816 = shalt.err (!%p813_p9)
}
  0x34   :  { %59 = dma.hbm_to_vmem [thread:$0]  %s1074_s5, 1024, %s54_s15, [#allocation6], %s871_s21, %s871_s21, %s872_s22  }
  0x35   :  { %s817_s30 = scalar_lea.hbm %s1076_s7, 1024 }
  0x36   :  { %p818_p10 = scmp.ne.s32.totalorder %s1076_s7, %s817_s30  ;;  %p821_p11 = scmp.lt.u32.totalorder %s817_s30, %s1076_s7 }
  0x38   :  { %p823_p12 = pnand %p821_p11, %p818_p10 }
  0x3a   :  { %826 = shalt.err (!%p823_p12)
}
  0x3b   :  { %s827_s14 = scalar_lea.vmem %s965_s17, 1024  ;;  %p832_p0 = scmp.lt.s32.totalorder %s965_s17, %s965_s17 }
  0x3c   :  { %p828_p13 = scmp.ne.s32.totalorder %s965_s17, %s827_s14  ;;  %p833_p1 = scmp.lt.s32.totalorder %s827_s14, %s827_s14 }
  0x3e   :  { %p834_p2 = por %p833_p1, %p832_p0 }
  0x40   :  { %p835_p3 = pnand %p834_p2, %p828_p13 }
  0x42   :  { %838 = shalt.err (!%p835_p3)
}
  0x43   :  { %73 = dma.hbm_to_vmem [thread:$0]  %s1076_s7, 1024, %s965_s17, [#allocation9], %s871_s21, %s871_s21, %s872_s22  }
  0x44   :  { %861 = dma.done.wait [#allocation3], 1024  }
  0x45   :  { %862 = vsyncadd [#allocation3], 4294966272 }
  0x46   :  { %863 = dma.done.wait [#allocation6], 2048  }
  0x47   :  { %864 = vsyncadd [#allocation6], 4294965248 }
  0x48   :  { %865 = dma.done.wait [#allocation9], 1024  }
  0x49   :  { %866 = vsyncadd [#allocation9], 4294966272  ;;  %v875_v0 = vmov 0.0   ;;  %vm876_vm0 = vmmov 0   ;;  %v719_v1 = vld [vmem:[#allocation2] sm:$0xff]   ;;  %v720_v2 = vld [vmem:[#allocation2 + $0x8] sm:$0xff]  }
  0x4a   :  { %630 = vmatprep.subr.bf16.mxu0 %v875_v0  ;;  %646 = vmatprep.mubr.msk.bf16.mxu0 %vm876_vm0, %v875_v0  ;;  %v721_v3 = vld [vmem:[#allocation2 + $0x10] sm:$0xff]   ;;  %v727_v4 = vld [vmem:[#allocation5] sm:$0xff]   ;;  %v722_v5 = vld [vmem:[#allocation2 + $0x18] sm:$0xff]   ;;  %s877_s20 = smov [#allocation10]  }
  0x4b   :  { %650 = vmatprep.subr.bf16.mxu1 %v875_v0  ;;  %666 = vmatprep.mubr.msk.bf16.mxu1 %vm876_vm0, %v875_v0  ;;  %v728_v6 = vld [vmem:[#allocation5 + $0x8] sm:$0xff]   ;;  %v723_v7 = vld [vmem:[#allocation2 + $0x20] sm:$0xff]   ;;  %v729_v8 = vld [vmem:[#allocation5 + $0x10] sm:$0xff]   ;;  %s547_s23 = sshll.u32 %s877_s20, 4  ;;  %s548_s23 = int_to_ptr.vmem [resolvable:$true] %s547_s23 }
  0x4c   :  { %631 = vmatpush3.bf16.msra.mxu0 %v719_v1  ;;  %651 = vmatpush3.bf16.msra.mxu1 %v727_v4  ;;  %v724_v9 = vld [vmem:[#allocation2 + $0x28] sm:$0xff]   ;;  %v730_v10 = vld [vmem:[#allocation5 + $0x18] sm:$0xff]   ;;  %v725_v11 = vld [vmem:[#allocation2 + $0x30] sm:$0xff]   ;;  %p844_p5 = scmp.lt.s32.totalorder %s548_s23, %s548_s23 }
  0x4d   :  { %632 = vmatprep.subr.bf16.mxu0 %v875_v0  ;;  %652 = vmatprep.subr.bf16.mxu1 %v875_v0  ;;  %v731_v12 = vld [vmem:[#allocation5 + $0x20] sm:$0xff]   ;;  %v726_v13 = vld [vmem:[#allocation2 + $0x38] sm:$0xff]   ;;  %v732_v14 = vld [vmem:[#allocation5 + $0x28] sm:$0xff]  }
  0x4e   :  { %v89_v15 = vld [vmem:[%s1069_s0] sm:$0xf]  ;;  %v733_v16 = vld [vmem:[#allocation5 + $0x30] sm:$0xff]   ;;  %v734_v17 = vld [vmem:[#allocation5 + $0x38] sm:$0xff]  }
  0x4f   :  { %v735_v18 = vld [vmem:[#allocation7] sm:$0xff]   ;;  %v736_v19 = vld [vmem:[#allocation7 + $0x8] sm:$0xff]   ;;  %v737_v20 = vld [vmem:[#allocation7 + $0x10] sm:$0xff]  }
  0x50   :  { %633 = vmatpush3.bf16.msra.mxu0 %v720_v2  ;;  %653 = vmatpush3.bf16.msra.mxu1 %v728_v6  ;;  %v738_v21 = vld [vmem:[#allocation7 + $0x18] sm:$0xff]   ;;  %v739_v22 = vld [vmem:[#allocation7 + $0x20] sm:$0xff]   ;;  %v740_v23 = vld [vmem:[#allocation7 + $0x28] sm:$0xff]  }
  0x51   :  { %634 = vmatprep.subr.bf16.mxu0 %v875_v0  ;;  %654 = vmatprep.subr.bf16.mxu1 %v875_v0  ;;  %v558_v24 = vld [vmem:[%s1071_s2] ss:$0 sm:$0xff]  ;;  %v741_v32 = vld [vmem:[#allocation7 + $0x30] sm:$0xff]   ;;  %v742_v33 = vld [vmem:[#allocation7 + $0x38] sm:$0xff]  }
  0x52   :  { %v743_v34 = vld [vmem:[#allocation8] sm:$0xff]   ;;  %v744_v35 = vld [vmem:[#allocation8 + $0x8] sm:$0xff]   ;;  %v745_v36 = vld [vmem:[#allocation8 + $0x10] sm:$0xff]  }
  0x53   :  { %v746_v37 = vld [vmem:[#allocation8 + $0x18] sm:$0xff]   ;;  %v747_v38 = vld [vmem:[#allocation8 + $0x20] sm:$0xff]   ;;  %v748_v39 = vld [vmem:[#allocation8 + $0x28] sm:$0xff]  }
  0x54   :  { %635 = vmatpush3.bf16.msra.mxu0 %v721_v3  ;;  %655 = vmatpush3.bf16.msra.mxu1 %v729_v8  ;;  %v567_v40 = vld [vmem:[%s1073_s4] ss:$0 sm:$0xff]  ;;  %v749_v48 = vld [vmem:[#allocation8 + $0x30] sm:$0xff]   ;;  %v750_v49 = vld [vmem:[#allocation8 + $0x38] sm:$0xff]  }
  0x55   :  { %636 = vmatprep.subr.bf16.mxu0 %v875_v0  ;;  %656 = vmatprep.subr.bf16.mxu1 %v875_v0  ;;  %v576_v50 = vld [vmem:[%s1075_s6] ss:$0 sm:$0xff]  ;;  %s839_s6 = scalar_lea.vmem %s548_s23, 128 }
  0x56   :  { %v585_v58 = vld [vmem:[%s1077_s8] ss:$0 sm:$0xff]  ;;  %p840_p4 = scmp.ne.s32.totalorder %s548_s23, %s839_s6  ;;  %p845_p6 = scmp.lt.s32.totalorder %s839_s6, %s839_s6 }
  0x58   :  { %637 = vmatpush3.bf16.msra.mxu0 %v722_v5  ;;  %657 = vmatpush3.bf16.msra.mxu1 %v730_v10  ;;  %p846_p7 = por %p845_p6, %p844_p5 }
  0x59   :  { %638 = vmatprep.subr.bf16.mxu0 %v875_v0  ;;  %658 = vmatprep.subr.bf16.mxu1 %v875_v0 }
  0x5a   :  { %p847_p8 = pnand %p846_p7, %p840_p4 }
  0x5c   :  { %639 = vmatpush3.bf16.msra.mxu0 %v723_v7  ;;  %659 = vmatpush3.bf16.msra.mxu1 %v731_v12 }
  0x5d   :  { %640 = vmatprep.subr.bf16.mxu0 %v875_v0  ;;  %660 = vmatprep.subr.bf16.mxu1 %v875_v0 }
  0x60   :  { %641 = vmatpush3.bf16.msra.mxu0 %v724_v9  ;;  %661 = vmatpush3.bf16.msra.mxu1 %v732_v14 }
  0x61   :  { %642 = vmatprep.subr.bf16.mxu0 %v875_v0  ;;  %662 = vmatprep.subr.bf16.mxu1 %v875_v0 }
  0x64   :  { %643 = vmatpush3.bf16.msra.mxu0 %v725_v11  ;;  %663 = vmatpush3.bf16.msra.mxu1 %v733_v16 }
  0x65   :  { %644 = vmatprep.subr.bf16.mxu0 %v875_v0  ;;  %664 = vmatprep.subr.bf16.mxu1 %v875_v0 }
  0x68   :  { %645 = vmatpush3.bf16.msra.mxu0 %v726_v13  ;;  %665 = vmatpush3.bf16.msra.mxu1 %v734_v17 }
  0x69   :  { %670 = vmatprep.subr.bf16.mxu0 %v875_v0  ;;  %690 = vmatprep.subr.bf16.mxu1 %v875_v0 }
  0x6b   :  { %647 = vmatmul.mubr.bf16.vlgmr.msra.gmra.mrb[0].mxu0 %v89_v15 }
  0x6c   :  { %686 = vmatprep.mubr.msk.bf16.mxu0 %vm876_vm0, %v875_v0  ;;  %671 = vmatpush3.bf16.msra.mxu0 %v735_v18 }
  0x6d   :  { %672 = vmatprep.subr.bf16.mxu0 %v875_v0 }
  0x70   :  { %673 = vmatpush3.bf16.msra.mxu0 %v736_v19 }
  0x71   :  { %674 = vmatprep.subr.bf16.mxu0 %v875_v0 }
  0x74   :  { %675 = vmatpush3.bf16.msra.mxu0 %v737_v20 }
  0x75   :  { %676 = vmatprep.subr.bf16.mxu0 %v875_v0 }
  0x78   :  { %677 = vmatpush3.bf16.msra.mxu0 %v738_v21 }
  0x79   :  { %678 = vmatprep.subr.bf16.mxu0 %v875_v0 }
  0x7c   :  { %679 = vmatpush3.bf16.msra.mxu0 %v739_v22 }
  0x7d   :  { %680 = vmatprep.subr.bf16.mxu0 %v875_v0 }
  0x80   :  { %681 = vmatpush3.bf16.msra.mxu0 %v740_v23 }
  0x81   :  { %682 = vmatprep.subr.bf16.mxu0 %v875_v0 }
  0x84   :  { %683 = vmatpush3.bf16.msra.mxu0 %v741_v32 }
  0x85   :  { %684 = vmatprep.subr.bf16.mxu0 %v875_v0 }
  0x88   :  { %685 = vmatpush3.bf16.msra.mxu0 %v742_v33 }
 0x13e   :  { %v195_v25 = vpop.f32.mrb[0].mxu0 }
 0x13f   :  { %v196_v26 = vadd.f32 %v558_v24, %v195_v25  ;;  %v648_v27 = vpop.f32.mrb[1].mxu0 }
 0x140   :  { %v198_v28 = vpop.f32.mrb[2].mxu0 }
 0x141   :  { %v201_v29 = vmax.f32 %v196_v26, 0.0  ;;  %v649_v30 = vpop.f32.mrb[3].mxu0 }
 0x143   :  { %v202_v31 = vpack.c.bf16 %v201_v29, %v201_v29 }
 0x145   :  { %667 = vmatmul.mubr.bf16.vlgmr.msra.gmra.mrb[0].mxu1 %v202_v31 }
 0x146   :  { %706 = vmatprep.mubr.msk.bf16.mxu1 %vm876_vm0, %v875_v0  ;;  %691 = vmatpush3.bf16.msra.mxu1 %v743_v34 }
 0x147   :  { %692 = vmatprep.subr.bf16.mxu1 %v875_v0 }
 0x14a   :  { %693 = vmatpush3.bf16.msra.mxu1 %v744_v35 }
 0x14b   :  { %694 = vmatprep.subr.bf16.mxu1 %v875_v0 }
 0x14e   :  { %695 = vmatpush3.bf16.msra.mxu1 %v745_v36 }
 0x14f   :  { %696 = vmatprep.subr.bf16.mxu1 %v875_v0 }
 0x152   :  { %697 = vmatpush3.bf16.msra.mxu1 %v746_v37 }
 0x153   :  { %698 = vmatprep.subr.bf16.mxu1 %v875_v0 }
 0x156   :  { %699 = vmatpush3.bf16.msra.mxu1 %v747_v38 }
 0x157   :  { %700 = vmatprep.subr.bf16.mxu1 %v875_v0 }
 0x15a   :  { %701 = vmatpush3.bf16.msra.mxu1 %v748_v39 }
 0x15b   :  { %702 = vmatprep.subr.bf16.mxu1 %v875_v0 }
 0x15e   :  { %703 = vmatpush3.bf16.msra.mxu1 %v749_v48 }
 0x15f   :  { %704 = vmatprep.subr.bf16.mxu1 %v875_v0 }
 0x162   :  { %705 = vmatpush3.bf16.msra.mxu1 %v750_v49 }
 0x218   :  { %v308_v41 = vpop.f32.mrb[0].mxu1 }
 0x219   :  { %v309_v42 = vadd.f32 %v567_v40, %v308_v41  ;;  %v668_v43 = vpop.f32.mrb[1].mxu1 }
 0x21a   :  { %v311_v44 = vpop.f32.mrb[2].mxu1 }
 0x21b   :  { %v314_v45 = vmax.f32 %v309_v42, 0.0  ;;  %v669_v46 = vpop.f32.mrb[3].mxu1 }
 0x21d   :  { %v315_v47 = vpack.c.bf16 %v314_v45, %v314_v45 }
 0x21f   :  { %687 = vmatmul.mubr.bf16.vlgmr.msra.gmra.mrb[4].mxu0 %v315_v47 }
 0x2f2   :  { %v421_v51 = vpop.f32.mrb[4].mxu0 }
 0x2f3   :  { %v422_v52 = vadd.f32 %v576_v50, %v421_v51  ;;  %v688_v53 = vpop.f32.mrb[5].mxu0 }
 0x2f4   :  { %v424_v54 = vpop.f32.mrb[6].mxu0 }
 0x2f5   :  { %v427_v55 = vmax.f32 %v422_v52, 0.0  ;;  %v689_v56 = vpop.f32.mrb[7].mxu0 }
 0x2f7   :  { %v428_v57 = vpack.c.bf16 %v427_v55, %v427_v55 }
 0x2f9   :  { %707 = vmatmul.mubr.bf16.vlgmr.msra.gmra.mrb[4].mxu1 %v428_v57 }
 0x3cc   :  { %v534_v59 = vpop.f32.mrb[4].mxu1 }
 0x3cd   :  { %v535_v60 = vadd.f32 %v585_v58, %v534_v59  ;;  %v708_v61 = vpop.f32.mrb[5].mxu1 }
 0x3ce   :  { %v537_v62 = vpop.f32.mrb[6].mxu1 }
 0x3cf   :  { %540 = vst [vmem:[#allocation10] sm:$0xff] %v535_v60  ;;  %v709_v63 = vpop.f32.mrb[7].mxu1 }
 0x3d0   :  { %850 = shalt.err (!%p847_p8)
}
 0x3d1   :  { %s851_s8 = scalar_lea.hbm %s1078_s9, 128 }
 0x3d2   :  { %p852_p9 = scmp.ne.s32.totalorder %s1078_s9, %s851_s8  ;;  %p855_p10 = scmp.lt.u32.totalorder %s851_s8, %s1078_s9 }
 0x3d4   :  { %p857_p11 = pnand %p855_p10, %p852_p9 }
 0x3d6   :  { %860 = shalt.err (!%p857_p11)
}
 0x3d7   :  { %550 = dma.vmem_to_hbm [thread:$0]  %s548_s23, 128, %s1078_s9, [#allocation4]  }
 0x3d8   :  { %867 = dma.done.wait [#allocation4], 128  }
 0x3d9   :  { %868 = vsyncadd [#allocation4], 4294967168 }
 0x3da   :  { %554 = vsyncpa [#allocation3], 1 }
 0x3db   :  { %555 = vsyncpa [#allocation6], 1 }
 0x3dc   :  { %556 = vsyncpa [#allocation9], 1 }
 0x3dd   :  { %557 = vsyncpa [#allocation4], 1 }

</bundles_post_ra>
